<compile_context>
chip_gen: v7x
topology: tpu7x:2x2x1
jax: 0.10.0
libtpu: 0.0.40
codegen_flags: <defaults>
</compile_context>

<pallas_src>
import jax
import jax.numpy as jnp
from jax.experimental import pallas as pl
from jax.experimental.pallas import tpu as pltpu


def _attention_kernel(dec_ref, enc_ref, wdec_ref, wenc_ref, b_ref, out_ref):
    # dec_ref : (TB, Ddec)   decoder hidden tile (f32)
    # enc_ref : (S, TB, 2E)  encoder outputs tile, original seq-first layout (f32)
    # wdec_ref: (Ddec, A)    Linear weight slice for the decoder part (bf16, pinned)
    # wenc_ref: (2E, A)      Linear weight slice for the encoder part (bf16, pinned)
    # b_ref   : (1, A)       Linear bias (f32, pinned)
    # out_ref : (TB, S)      softmax attention weights over src_len
    S, TB, E2 = enc_ref.shape
    A = wenc_ref.shape[1]
    mxu_dtype = wenc_ref.dtype

    wdec = wdec_ref[...]
    wenc = wenc_ref[...]
    bias = b_ref[...]

    # Decoder projection + bias: (TB, A); bf16 MXU inputs, f32 accumulation.
    dec_proj = jnp.dot(dec_ref[...].astype(mxu_dtype), wdec,
                       preferred_element_type=jnp.float32) + bias

    # Flatten (S, TB, 2E) -> (S*TB, 2E): one tall matmul (M = S*TB) instead of
    # S tiny batched contractions -> far better MXU occupancy.
    enc_flat = enc_ref[...].reshape(S * TB, E2).astype(mxu_dtype)
    enc_proj = jnp.dot(enc_flat, wenc,
                       preferred_element_type=jnp.float32)        # (S*TB, A)

    # energy = tanh(W [dec ; enc] + b); dec_proj broadcast over src_len.
    energy = jnp.tanh(enc_proj.reshape(S, TB, A) + dec_proj[None, :, :])

    # A-axis reduction as a ones-vector matmul: the MXU is idle at this point
    # and this keeps the XLU free for the softmax max/sum reductions.
    logits = jnp.dot(energy.reshape(S * TB, A),
                     jnp.ones((A, 1), jnp.float32),
                     preferred_element_type=jnp.float32).reshape(S, TB)

    # Numerically-stable softmax over src_len. Only the small (S, TB) logits
    # tile is transposed (XLU), so the output is written batch-major (TB, S)
    # directly -- no host-side permute of anything.
    logits_t = logits.T                                           # (TB, S)
    m = jnp.max(logits_t, axis=1, keepdims=True)
    e = jnp.exp(logits_t - m)
    denom = jnp.sum(e, axis=1, keepdims=True)
    out_ref[...] = (e * pl.reciprocal(denom, approx=True)).astype(out_ref.dtype)


def _choose_batch_tile(B, S, E2, A, vmem_budget_bytes):
    """Largest batch tile TB (multiple of 8, dividing B when B > 8) whose
    double-buffered f32 encoder tile + f32 temporaries fit in the budget."""
    if B <= 8:
        return B
    best = None
    for tb in range(8, B + 1, 8):
        if B % tb:
            continue
        # 2x double-buffered f32 enc tile + ~4 f32 (S, TB, A) temporaries.
        need = 2 * S * tb * E2 * 4 + 4 * S * tb * A * 4
        if need <= vmem_budget_bytes:
            best = tb
    return best if best is not None else B  # fall back to untiled batch


def attention_forward(decoder_hidden, encoder_outputs, weight, bias,
                      dec_hid_dim, *, mxu_dtype=jnp.bfloat16,
                      vmem_limit_bytes=48 * 1024 * 1024):
    """decoder_hidden: (B, dec_hid_dim); encoder_outputs: (S, B, 2*enc_hid_dim)
    in the original PyTorch seq-first layout (consumed directly -- no host
    transpose). weight: (attn_in, attn_dim), attn_in = dec_hid_dim + 2*enc_hid.
    Returns softmax attention weights of shape (B, S), f32."""
    B, d_dec = decoder_hidden.shape
    S, Be, E2 = encoder_outputs.shape
    assert Be == B and d_dec == dec_hid_dim
    A = weight.shape[1]

    # Split the Linear weight so  cat([dec, enc]) @ W == dec @ W_dec + enc @ W_enc
    # (matches torch.cat order: [repeated_decoder_hidden, encoder_outputs]).
    # Weights are tiny, pinned in VMEM, and fed to the MXU in bf16; all
    # accumulation / tanh / softmax run in f32.
    w_dec = weight[:dec_hid_dim, :].astype(mxu_dtype)          # (Ddec, A)
    w_enc = weight[dec_hid_dim:, :].astype(mxu_dtype)          # (2E, A)
    b2d = bias.reshape(1, -1).astype(jnp.float32)              # (1, A)

    # Size the batch tile for the smallest-VMEM generation (v7x: 64 MiB/TC vs
    # 128 MiB on v5e/v6e), accounting for BlockSpec 2x double-buffering.
    tile_budget = min(vmem_limit_bytes, 24 * 1024 * 1024)
    TB = _choose_batch_tile(B, S, E2, A, tile_budget)
    grid = (B // TB,)

    enc_bytes = encoder_outputs.size * jnp.dtype(encoder_outputs.dtype).itemsize
    cost = pl.CostEstimate(
        flops=2 * B * S * E2 * A + 2 * B * dec_hid_dim * A + 2 * B * S * A,
        transcendentals=B * S * A + B * S,          # tanh + exp
        bytes_accessed=(enc_bytes + decoder_hidden.size * 4
                        + (w_dec.size + w_enc.size) * 2 + b2d.size * 4
                        + B * S * 4),
    )

    return pl.pallas_call(
        _attention_kernel,
        out_shape=jax.ShapeDtypeStruct((B, S), jnp.float32),
        grid_spec=pltpu.PrefetchScalarGridSpec(
            num_scalar_prefetch=0,
            grid=grid,
            in_specs=[
                # Decoder hidden: one (TB, Ddec) tile per batch grid step.
                pl.BlockSpec((TB, d_dec), lambda b: (b, 0)),
                # Encoder outputs tiled over batch in their ORIGINAL (S, B, 2E)
                # layout; the layout handling lives in the index_map/DMA.
                pl.BlockSpec((S, TB, E2), lambda b: (0, b, 0)),
                # Weights / bias: constant block index -> DMA'd once, resident.
                pl.BlockSpec((d_dec, A), lambda b: (0, 0)),
                pl.BlockSpec((E2, A), lambda b: (0, 0)),
                pl.BlockSpec((1, A), lambda b: (0, 0)),
            ],
            out_specs=pl.BlockSpec((TB, S), lambda b: (b, 0)),
        ),
        compiler_params=pltpu.CompilerParams(
            # Batch axis is independent -> sharded across the 2 TCs on v7x,
            # harmless on single-TC v5e/v6e.
            dimension_semantics=("parallel",),
            vmem_limit_bytes=vmem_limit_bytes,
        ),
        cost_estimate=cost,
    )(decoder_hidden, encoder_outputs, w_dec, w_enc, b2d)


def _reference(decoder_hidden, encoder_outputs, weight, bias):
    # Pure-JAX f32 mirror of the PyTorch forward (for the sanity check).
    S = encoder_outputs.shape[0]
    rep = jnp.repeat(decoder_hidden[:, None, :], S, axis=1)          # (B, S, Ddec)
    enc = jnp.transpose(encoder_outputs, (1, 0, 2))                  # (B, S, 2E)
    cat = jnp.concatenate([rep, enc], axis=2)                        # (B, S, attn_in)
    energy = jnp.tanh(cat @ weight + bias)                           # (B, S, A)
    attn = jnp.sum(energy, axis=2)                                   # (B, S)
    return jax.nn.softmax(attn, axis=1)


if __name__ == "__main__":
    # Small shapes consistent with the module.
    batch = 2
    src_len = 8
    enc_hid_dim = 8          # encoder is bidirectional -> features = 2*enc_hid_dim = 16
    dec_hid_dim = 16
    attn_dim = 32
    attn_in = enc_hid_dim * 2 + dec_hid_dim

    key = jax.random.PRNGKey(0)
    k1, k2, k3, k4 = jax.random.split(key, 4)

    decoder_hidden = jax.random.normal(k1, (batch, dec_hid_dim), dtype=jnp.float32)
    encoder_outputs = jax.random.normal(
        k2, (src_len, batch, enc_hid_dim * 2), dtype=jnp.float32)

    # Deterministic Linear parameters (uniform like torch's default init scale).
    bound = 1.0 / (attn_in ** 0.5)
    weight = jax.random.uniform(k3, (attn_in, attn_dim), jnp.float32, -bound, bound)
    bias = jax.random.uniform(k4, (attn_dim,), jnp.float32, -bound, bound)

    out = attention_forward(decoder_hidden, encoder_outputs, weight, bias, dec_hid_dim)
    out = jax.block_until_ready(out)

    ref = _reference(decoder_hidden, encoder_outputs, weight, bias)
    assert out.shape == (batch, src_len)
    # bf16 MXU operands + approx-reciprocal softmax denominator -> ~1e-2 tolerance.
    assert jnp.allclose(out, ref, atol=2.5e-2, rtol=0.0)
    # Rows are still (approximately) a probability distribution.
    assert jnp.allclose(jnp.sum(out, axis=1), 1.0, atol=5e-3)

    print("KERNEL_OK")
</pallas_src>

<mosaic_0001>
module attributes {stable_mosaic.version = 11 : i64} {
  func.func @_attention_kernel(%arg0: i32, %arg1: memref<2x16xf32, #tpu.memory_space<vmem>>, %arg2: memref<8x2x16xf32, #tpu.memory_space<vmem>>, %arg3: memref<16x32xbf16, #tpu.memory_space<vmem>>, %arg4: memref<16x32xbf16, #tpu.memory_space<vmem>>, %arg5: memref<1x32xf32, #tpu.memory_space<vmem>>, %arg6: memref<2x8xf32, #tpu.memory_space<vmem>>) attributes {dimension_semantics = [#tpu.dimension_semantics<parallel>], iteration_bounds = array<i64: 1>, scalar_prefetch = 0 : i64, scratch_operands = 0 : i64, tpu.core_type = #tpu.core_type<tc>, window_params = [{transform_indices = @transform_0, window_bounds = array<i64: 2, 16>}, {transform_indices = @transform_1, window_bounds = array<i64: 8, 2, 16>}, {pipeline_mode = #tpu.pipeline_mode<synchronous>, transform_indices = @transform_2, window_bounds = array<i64: 16, 32>}, {pipeline_mode = #tpu.pipeline_mode<synchronous>, transform_indices = @transform_3, window_bounds = array<i64: 16, 32>}, {pipeline_mode = #tpu.pipeline_mode<synchronous>, transform_indices = @transform_4, window_bounds = array<i64: 1, 32>}, {transform_indices = @transform_5, window_bounds = array<i64: 2, 8>}]} {
    %c0 = arith.constant 0 : index
    %c0_0 = arith.constant 0 : index
    %0 = vector.load %arg3[%c0, %c0_0] : memref<16x32xbf16, #tpu.memory_space<vmem>>, vector<16x32xbf16>
    %c0_1 = arith.constant 0 : index
    %c0_2 = arith.constant 0 : index
    %1 = vector.load %arg4[%c0_1, %c0_2] : memref<16x32xbf16, #tpu.memory_space<vmem>>, vector<16x32xbf16>
    %c0_3 = arith.constant 0 : index
    %c0_4 = arith.constant 0 : index
    %2 = vector.load %arg5[%c0_3, %c0_4] : memref<1x32xf32, #tpu.memory_space<vmem>>, vector<1x32xf32>
    %c0_5 = arith.constant 0 : index
    %c0_6 = arith.constant 0 : index
    %3 = vector.load %arg1[%c0_5, %c0_6] : memref<2x16xf32, #tpu.memory_space<vmem>>, vector<2x16xf32>
    %4 = arith.truncf %3 : vector<2x16xf32> to vector<2x16xbf16>
    %cst = arith.constant dense<0.000000e+00> : vector<2x32xf32>
    %5 = tpu.matmul %4, %0, %cst {dimension_numbers = #tpu.dot_dimension_numbers<[1], [0], [0], [1], [0, 0, 1, 1], [], []>} : vector<2x16xbf16>, vector<16x32xbf16>, vector<2x32xf32> -> vector<2x32xf32>
    %6 = vector.broadcast %2 : vector<1x32xf32> to vector<2x32xf32>
    %7 = arith.addf %5, %6 : vector<2x32xf32>
    %c0_7 = arith.constant 0 : index
    %c0_8 = arith.constant 0 : index
    %c0_9 = arith.constant 0 : index
    %8 = vector.load %arg2[%c0_7, %c0_8, %c0_9] : memref<8x2x16xf32, #tpu.memory_space<vmem>>, vector<8x2x16xf32>
    %9 = vector.shape_cast %8 : vector<8x2x16xf32> to vector<16x16xf32>
    %10 = arith.truncf %9 : vector<16x16xf32> to vector<16x16xbf16>
    %cst_10 = arith.constant dense<0.000000e+00> : vector<16x32xf32>
    %11 = tpu.matmul %10, %1, %cst_10 {dimension_numbers = #tpu.dot_dimension_numbers<[1], [0], [0], [1], [0, 0, 1, 1], [], []>} : vector<16x16xbf16>, vector<16x32xbf16>, vector<16x32xf32> -> vector<16x32xf32>
    %12 = vector.shape_cast %11 : vector<16x32xf32> to vector<8x2x32xf32>
    %13 = vector.shape_cast %7 : vector<2x32xf32> to vector<1x2x32xf32>
    %14 = vector.broadcast %13 : vector<1x2x32xf32> to vector<8x2x32xf32>
    %15 = arith.addf %12, %14 : vector<8x2x32xf32>
    %16 = math.tanh %15 : vector<8x2x32xf32>
    %17 = vector.shape_cast %16 : vector<8x2x32xf32> to vector<16x32xf32>
    %cst_11 = arith.constant 1.000000e+00 : f32
    %18 = vector.broadcast %cst_11 : f32 to vector<32x1xf32>
    %cst_12 = arith.constant dense<0.000000e+00> : vector<16x1xf32>
    %19 = tpu.matmul %17, %18, %cst_12 {dimension_numbers = #tpu.dot_dimension_numbers<[1], [0], [0], [1], [0, 0, 1, 1], [], []>} : vector<16x32xf32>, vector<32x1xf32>, vector<16x1xf32> -> vector<16x1xf32>
    %20 = vector.shape_cast %19 : vector<16x1xf32> to vector<8x2xf32>
    %21 = tpu.transpose %20, [1, 0] : vector<8x2xf32> -> vector<2x8xf32>
    %cst_13 = arith.constant dense<0xFF800000> : vector<2xf32>
    %22 = vector.multi_reduction <maximumf>, %21, %cst_13 [1] : vector<2x8xf32> to vector<2xf32>
    %23 = vector.shape_cast %22 : vector<2xf32> to vector<2x1xf32>
    %24 = vector.broadcast %23 : vector<2x1xf32> to vector<2x8xf32>
    %25 = arith.subf %21, %24 : vector<2x8xf32>
    %26 = math.exp %25 : vector<2x8xf32>
    %cst_14 = arith.constant dense<0.000000e+00> : vector<2xf32>
    %27 = vector.multi_reduction <add>, %26, %cst_14 [1] : vector<2x8xf32> to vector<2xf32>
    %28 = vector.shape_cast %27 : vector<2xf32> to vector<2x1xf32>
    %29 = tpu.reciprocal %28 {approx = true} : vector<2x1xf32> -> vector<2x1xf32>
    %30 = vector.broadcast %29 : vector<2x1xf32> to vector<2x8xf32>
    %31 = arith.mulf %26, %30 : vector<2x8xf32>
    %c0_15 = arith.constant 0 : index
    %c0_16 = arith.constant 0 : index
    %32 = vector.load %arg6[%c0_15, %c0_16] : memref<2x8xf32, #tpu.memory_space<vmem>>, vector<2x8xf32>
    tpu.vector_store %arg6[%c0_15, %c0_16], %31 {strides = array<i32>} : memref<2x8xf32, #tpu.memory_space<vmem>>, vector<2x8xf32>,
    return
  }
  func.func @transform_0(%arg0: i32) -> (i32, i32) {
    %c0_i32 = arith.constant 0 : i32
    %c0_i32_0 = arith.constant 0 : i32
    return %arg0, %c0_i32 : i32, i32
  }
  func.func @transform_1(%arg0: i32) -> (i32, i32, i32) {
    %c0_i32 = arith.constant 0 : i32
    %c0_i32_0 = arith.constant 0 : i32
    %c0_i32_1 = arith.constant 0 : i32
    return %c0_i32, %arg0, %c0_i32_0 : i32, i32, i32
  }
  func.func @transform_2(%arg0: i32) -> (i32, i32) {
    %c0_i32 = arith.constant 0 : i32
    %c0_i32_0 = arith.constant 0 : i32
    %c0_i32_1 = arith.constant 0 : i32
    return %c0_i32, %c0_i32_0 : i32, i32
  }
  func.func @transform_3(%arg0: i32) -> (i32, i32) {
    %c0_i32 = arith.constant 0 : i32
    %c0_i32_0 = arith.constant 0 : i32
    %c0_i32_1 = arith.constant 0 : i32
    return %c0_i32, %c0_i32_0 : i32, i32
  }
  func.func @transform_4(%arg0: i32) -> (i32, i32) {
    %c0_i32 = arith.constant 0 : i32
    %c0_i32_0 = arith.constant 0 : i32
    %c0_i32_1 = arith.constant 0 : i32
    return %c0_i32, %c0_i32_0 : i32, i32
  }
  func.func @transform_5(%arg0: i32) -> (i32, i32) {
    %c0_i32 = arith.constant 0 : i32
    %c0_i32_0 = arith.constant 0 : i32
    return %arg0, %c0_i32 : i32, i32
  }
}

</mosaic_0001>

<bundles_post_ra>
// kernel: tpu_custom_call.1
= control target key start
LH: loop header
LB: loop body
LE: loop exit
PB: predicated region body
PF: predicated region fallthrough
CT: control target
= control target key end

     0   :  { %10 = vsyncpa [#allocation3], 0  ;;  %s944_s0 = inlined_call_operand.hbm [shape: f32[2,16], index: 0, kind: input, shape index: {}]   ;;  %s945_s1 = inlined_call_operand.hbm [shape: f32[8,2,16], index: 1, kind: input, shape index: {}]   ;;  %s946_s2 = inlined_call_operand.hbm [shape: bf16[16,32], index: 2, kind: input, shape index: {}]   ;;  %s947_s3 = inlined_call_operand.vmem [shape: bf16[16,32], index: 3, kind: input, shape index: {}]   ;;  %s948_s4 = inlined_call_operand.vmem [shape: f32[1,32], index: 4, kind: input, shape index: {}]   ;;  %s949_s5 = inlined_call_operand.hbm [shape: f32[2,8], index: 5, kind: output, shape index: {}]  }
   0x1   :  { %11 = vsyncpa [#allocation6], 0 }
   0x2   :  { %12 = vsyncpa [#allocation4], 0  ;;  %s810_s18 = smov [#allocation5]   ;;  %s716_s22 = scalar_lea.hbm %s945_s1, 256 }
   0x3   :  { %s28_s19 = sshll.u32 %s810_s18, 4  ;;  %p717_p0 = scmp.ne.s32.totalorder %s945_s1, %s716_s22  ;;  %s29_s19 = int_to_ptr.vmem [resolvable:$true] %s28_s19 }
   0x4   :  { %p720_p1 = scmp.lt.u32.totalorder %s716_s22, %s945_s1 }
   0x6   :  { %p722_p2 = pnand %p720_p1, %p717_p0 }
   0x8   :  { %725 = shalt.err (!%p722_p2)
}
   0x9   :  { %s726_s27 = scalar_lea.vmem %s29_s19, 256  ;;  %p731_p4 = scmp.lt.s32.totalorder %s29_s19, %s29_s19 }
   0xa   :  { %p727_p3 = scmp.ne.s32.totalorder %s29_s19, %s726_s27  ;;  %p732_p5 = scmp.lt.s32.totalorder %s726_s27, %s726_s27 }
   0xc   :  { %p733_p6 = por %p732_p5, %p731_p4 }
   0xe   :  { %p734_p7 = pnand %p733_p6, %p727_p3 }
  0x10   :  { %737 = shalt.err (!%p734_p7)
}
  0x11   :  { %s811_s28 = smov 32   ;;  %s812_s29 = smov 2  }
  0x12   :  { %34 = dma.hbm_to_vmem [thread:$0]  %s945_s1, 256, %s29_s19, [#allocation6], %s811_s28, %s811_s28, %s812_s29  }
  0x13   :  { %s813_s7 = smov [#allocation2]   ;;  %s814_s9 = smov [#allocation7]  }
  0x14   :  { %s19_s8 = sshll.u32 %s813_s7, 4  ;;  %s40_s10 = sshll.u32 %s814_s9, 4  ;;  %s20_s8 = int_to_ptr.vmem [resolvable:$true] %s19_s8  ;;  %s41_s10 = int_to_ptr.vmem [resolvable:$true] %s40_s10 }
  0x15   :  { %s738_s13 = scalar_lea.hbm %s944_s0, 32 }
  0x16   :  { %p739_p8 = scmp.ne.s32.totalorder %s944_s0, %s738_s13  ;;  %p742_p9 = scmp.lt.u32.totalorder %s738_s13, %s944_s0 }
  0x18   :  { %p744_p10 = pnand %p742_p9, %p739_p8 }
  0x1a   :  { %747 = shalt.err (!%p744_p10)
}
  0x1b   :  { %s748_s1 = scalar_lea.vmem %s20_s8, 32  ;;  %p753_p12 = scmp.lt.s32.totalorder %s20_s8, %s20_s8 }
  0x1c   :  { %p749_p11 = scmp.ne.s32.totalorder %s20_s8, %s748_s1  ;;  %p754_p13 = scmp.lt.s32.totalorder %s748_s1, %s748_s1 }
  0x1e   :  { %p755_p0 = por %p754_p13, %p753_p12 }
  0x20   :  { %p756_p1 = pnand %p755_p0, %p749_p11 }
  0x22   :  { %759 = shalt.err (!%p756_p1)
}
  0x23   :  { %22 = dma.hbm_to_vmem [thread:$0]  %s944_s0, 32, %s20_s8, [#allocation3]  }
  0x24   :  { %s760_s22 = scalar_lea.hbm %s946_s2, 128 }
  0x25   :  { %p761_p2 = scmp.ne.s32.totalorder %s946_s2, %s760_s22  ;;  %p764_p3 = scmp.lt.u32.totalorder %s760_s22, %s946_s2 }
  0x27   :  { %p766_p4 = pnand %p764_p3, %p761_p2 }
  0x29   :  { %769 = shalt.err (!%p766_p4)
}
  0x2a   :  { %s770_s27 = scalar_lea.vmem %s41_s10, 128  ;;  %p775_p6 = scmp.lt.s32.totalorder %s41_s10, %s41_s10 }
  0x2b   :  { %p771_p5 = scmp.ne.s32.totalorder %s41_s10, %s770_s27  ;;  %p776_p7 = scmp.lt.s32.totalorder %s770_s27, %s770_s27 }
  0x2d   :  { %p777_p8 = por %p776_p7, %p775_p6 }
  0x2f   :  { %p778_p9 = pnand %p777_p8, %p771_p5 }
  0x31   :  { %781 = shalt.err (!%p778_p9)
}
  0x32   :  { %s815_s0 = smov 64   ;;  %s816_s28 = smov 4  }
  0x33   :  { %46 = dma.hbm_to_vmem [thread:$0]  %s946_s2, 128, %s41_s10, [#allocation6], %s815_s0, %s815_s0, %s816_s28  }
  0x34   :  { %804 = dma.done.wait [#allocation3], 32  }
  0x35   :  { %805 = vsyncadd [#allocation3], 4294967264 }
  0x36   :  { %806 = dma.done.wait [#allocation6], 384  }
  0x37   :  { %807 = vsyncadd [#allocation6], 4294966912  ;;  %v145_v0 = vlaneseq  ;;  %v817_v1 = vmov 0.0   ;;  %vm818_vm0 = vmmov 0   ;;  %v819_v2 = vmov 1983009808  }
  0x38   :  { %652 = vmatprep.subr.bf16.mxu0 %v817_v1  ;;  %658 = vmatprep.subr.bf16.mxu1 %v817_v1  ;;  %v143_v3 = vunpack.c.l.s4 %v819_v2  ;;  %v694_v6 = vld [vmem:[#allocation7] sm:$0xff]   ;;  %vm80_vm1 = vcmask 130048   ;;  %v66_v9 = vld [vmem:[#allocation2] sm:$0x3]  ;;  %v124_v10 = vld [vmem:[#allocation5] sm:$0x3] }
  0x39   :  { %654 = vmatprep.mubr.msk.bf16.mxu0 %vm818_vm0, %v817_v1  ;;  %660 = vmatprep.mubr.msk.bf16.mxu1 %vm818_vm0, %v817_v1  ;;  %v890_v5 = vshrl.u32 %v145_v0, 7  ;;  %v695_v7 = vld [vmem:[%s947_s3] sm:$0xff]   ;;  %v125_v11 = vld [vmem:[#allocation5 + $0x2] sm:$0x3]  ;;  %v67_v12 = vpack.c.bf16 %v66_v9, %v66_v9  ;;  %v126_v13 = vld [vmem:[#allocation5 + $0x4] sm:$0x3] }
  0x3a   :  { %v144_v4 = vunpack.c.0.s8 %v143_v3  ;;  %653 = vmatpush3.bf16.msra.mxu0 %v694_v6  ;;  %659 = vmatpush3.bf16.msra.mxu1 %v695_v7  ;;  %v127_v14 = vld [vmem:[#allocation5 + $0x6] sm:$0x3]  ;;  %v128_v15 = vld [vmem:[#allocation5 + $0x8] sm:$0x3]  ;;  %v140_v16 = vcombine.low %v124_v10, %v125_v11  ;;  %v129_v17 = vld [vmem:[#allocation5 + $0xa] sm:$0x3] }
  0x3b   :  { %v130_v18 = vld [vmem:[#allocation5 + $0xc] sm:$0x3]  ;;  %v131_v19 = vld [vmem:[#allocation5 + $0xe] sm:$0x3]  ;;  %v141_v20 = vcombine.low %v126_v13, %v127_v14  ;;  %v157_v22 = vcombine.low %v128_v15, %v129_v17  ;;  %v820_v30 = vmov 1.0|1.0  }
  0x3c   :  { %v896_v8 = vsub.s32 %v144_v4, %v890_v5  ;;  %v158_v23 = vcombine.low %v130_v18, %v131_v19  ;;  %675 = vmatprep.subr.bf16.mxu0 %v820_v30  ;;  %v635_v35 = vld [vmem:[%s948_s4] ss:$0 sm:$0xff]  ;;  %vm329_vm2 = vcmask 261120   ;;  %vm559_vm3 = vcmask 1041409   ;;  %s822_s4 = smov [#allocation8]  }
  0x3d   :  { %655 = vmatmul.mubr.msk.bf16.vlgmr.msra.gmra.mrb[0].mxu0 %vm80_vm1, %v67_v12  ;;  %vm561_vm4 = vcmask 1042434   ;;  %vm563_vm5 = vcmask 1043459   ;;  %vm565_vm6 = vcmask 1044484   ;;  %vm567_vm7 = vcmask 1045509   ;;  %s625_s8 = sshll.u32 %s822_s4, 4  ;;  %s626_s8 = int_to_ptr.vmem [resolvable:$true] %s625_s8 }
  0x3e   :  { %v148_v21 = vrot.slane %v140_v16, %v896_v8  ;;  %v155_v24 = vrot.slane %v141_v20, %v896_v8  ;;  %v165_v25 = vrot.slane %v157_v22, %v896_v8  ;;  %v172_v26 = vrot.slane %v158_v23, %v896_v8  ;;  %676 = vmatpush3.bf16.msra.mxu0 %v820_v30  ;;  %s782_s9 = scalar_lea.vmem %s626_s8, 32  ;;  %p787_p11 = scmp.lt.s32.totalorder %s626_s8, %s626_s8 }
  0x3f   :  { %677 = vmatprep.subr.bf16.mxu0 %v820_v30  ;;  %v821_v16 = vmov 0   ;;  %vm569_vm8 = vcmask 1046534   ;;  %vm571_vm9 = vcmask 1047559   ;;  %vm606_vm10 = vcmask 58368   ;;  %p783_p10 = scmp.ne.s32.totalorder %s626_s8, %s782_s9  ;;  %p788_p12 = scmp.lt.s32.totalorder %s782_s9, %s782_s9 }
  0x40   :  { %v156_v27 = vcombine.low %v148_v21, %v155_v24  ;;  %v173_v28 = vcombine.low %v165_v25, %v172_v26  ;;  %692 = vset.pattern.permute.xlu0 %v821_v16  ;;  %693 = vset.pattern.permute.xlu1 %v821_v16 }
  0x41   :  { %p789_p13 = por %p788_p12, %p787_p11 }
  0x42   :  { %v176_v29 = vpack.c.bf16 %v173_v28, %v156_v27  ;;  %678 = vmatpush3.bf16.msra.mxu0 %v820_v30 }
  0x43   :  { %p790_p0 = pnand %p789_p13, %p783_p10 }
  0x44   :  { %661 = vmatmul.mubr.msk.bf16.vlgmr.msra.gmra.mrb[0].mxu1 %vm80_vm1, %v176_v29 }
 0x110   :  { %v118_v31 = vpop.f32.mrb[0].mxu0 }
 0x111   :  { %v656_v32 = vpop.f32.mrb[1].mxu0  ;;  %v119_v36 = vadd.f32 %v635_v35, %v118_v31 }
 0x112   :  { %v121_v33 = vpop.f32.mrb[2].mxu0 }
 0x113   :  { %v657_v34 = vpop.f32.mrb[3].mxu0 }
 0x117   :  { %v220_v37 = vpop.f32.mrb[0].mxu1 }
 0x118   :  { %v229_v38 = vcombine.high %v220_v37, %v220_v37  ;;  %v236_v39 = vrot.slane %v220_v37, %v896_v8  ;;  %v662_v40 = vpop.f32.mrb[1].mxu1  ;;  %v526_v37 = vand.u32 127, %v145_v0 }
 0x119   :  { %v223_v41 = vpop.f32.mrb[2].mxu1 }
 0x11a   :  { %v243_v42 = vrot.slane %v229_v38, %v896_v8  ;;  %v244_v43 = vcombine.high %v236_v39, %v236_v39  ;;  %v271_v44 = vadd.f32 %v236_v39, %v119_v36  ;;  %v246_v45 = vcombine.high %v223_v41, %v223_v41  ;;  %v663_v46 = vpop.f32.mrb[3].mxu1 }
 0x11b   :  { %v253_v47 = vrot.slane %v223_v41, %v896_v8  ;;  %v529_v40 = vsub.s32 %v526_v37, %v890_v5 }
 0x11c   :  { %v245_v48 = vcombine.high %v243_v42, %v243_v42  ;;  %v272_v49 = vadd.f32 %v244_v43, %v119_v36  ;;  %v273_v50 = vadd.f32 %v243_v42, %v119_v36  ;;  %696 = vtanh.f32 %v271_v44 }
 0x11d   :  { %v260_v51 = vrot.slane %v246_v45, %v896_v8  ;;  %v261_v52 = vcombine.high %v253_v47, %v253_v47  ;;  %v275_v53 = vadd.f32 %v253_v47, %v119_v36 }
 0x11e   :  { %v274_v54 = vadd.f32 %v245_v48, %v119_v36  ;;  %698 = vtanh.f32 %v272_v49 }
 0x11f   :  { %700 = vtanh.f32 %v273_v50  ;;  %v262_v55 = vcombine.high %v260_v51, %v260_v51  ;;  %v276_v56 = vadd.f32 %v261_v52, %v119_v36  ;;  %v277_v57 = vadd.f32 %v260_v51, %v119_v36 }
 0x120   :  { %702 = vtanh.f32 %v274_v54 }
 0x121   :  { %v278_v58 = vadd.f32 %v262_v55, %v119_v36  ;;  %704 = vtanh.f32 %v275_v53 }
 0x122   :  { %706 = vtanh.f32 %v276_v56 }
 0x123   :  { %708 = vtanh.f32 %v277_v57 }
 0x124   :  { %710 = vtanh.f32 %v278_v58 }
 0x126   :  { %v697_v59 = vpop.eup %696 }
 0x128   :  { %v699_v60 = vpop.eup %698 }
 0x129   :  { %v701_v61 = vpop.eup %700  ;;  %v295_v62 = vcombine.low %v697_v59, %v699_v60 }
 0x12a   :  { %v703_v63 = vpop.eup %702 }
 0x12b   :  { %v705_v1 = vpop.eup %704  ;;  %v296_v2 = vcombine.low %v701_v61, %v703_v63  ;;  %v303_v7 = vrot.slane %v295_v62, %v896_v8 }
 0x12c   :  { %v707_v3 = vpop.eup %706 }
 0x12d   :  { %v709_v4 = vpop.eup %708  ;;  %v312_v6 = vcombine.low %v705_v1, %v707_v3  ;;  %v310_v9 = vrot.slane %v296_v2, %v896_v8 }
 0x12e   :  { %v711_v10 = vpop.eup %710 }
 0x12f   :  { %v311_v11 = vcombine.low %v303_v7, %v310_v9  ;;  %v313_v12 = vcombine.low %v709_v4, %v711_v10  ;;  %v320_v13 = vrot.slane %v312_v6, %v896_v8 }
 0x131   :  { %672 = vmatprep.mubr.msk.f32.mxu0 %vm329_vm2, %v311_v11  ;;  %v327_v14 = vrot.slane %v313_v12, %v896_v8 }
 0x133   :  { %v328_v15 = vcombine.low %v320_v13, %v327_v14 }
 0x135   :  { %673 = vmatmul.mubr.msk.f32.vlgmr.msra.gmra.mrb[4].mxu0 %vm329_vm2, %v328_v15 }
 0x208   :  { %v674_v17 = vpop.f32.mrb[4].mxu0 }
 0x209   :  { %v435_v18 = vrot.slane %v674_v17, %v896_v8  ;;  %v400_v19 = vpop.f32.mrb[5].mxu0  ;;  %v428_v25 = vcombine.high %v674_v17, %v674_v17 }
 0x20a   :  { %v411_v20 = vcombine.high %v400_v19, %v400_v19  ;;  %v418_v21 = vrot.slane %v400_v19, %v896_v8 }
 0x20b   :  { %v443_v22 = vcombine.high %v435_v18, %v435_v18  ;;  %v442_v29 = vrot.slane %v428_v25, %v896_v8  ;;  %v479_v32 = vrot.slane %v435_v18, %v896_v8 }
 0x20c   :  { %v426_v23 = vcombine.high %v418_v21, %v418_v21  ;;  %v451_v24 = vrot.slane %v418_v21, %v896_v8  ;;  %v425_v26 = vrot.slane %v411_v20, %v896_v8 }
 0x20d   :  { %v486_v27 = vrot.slane %v443_v22, %v896_v8  ;;  %v444_v33 = vcombine.high %v442_v29, %v442_v29  ;;  %v493_v35 = vrot.slane %v442_v29, %v896_v8 }
 0x20e   :  { %502 = vperm.xlu0 %692, %v451_v24   ;;  %v458_v28 = vrot.slane %v426_v23, %v896_v8  ;;  %v427_v30 = vcombine.high %v425_v26, %v425_v26  ;;  %v465_v31 = vrot.slane %v425_v26, %v896_v8 }
 0x20f   :  { %517 = vperm.xlu1 %693, %v486_v27   ;;  %v500_v36 = vrot.slane %v444_v33, %v896_v8 }
 0x210   :  { %v472_v34 = vrot.slane %v427_v30, %v896_v8 }
 0x212   :  { %505 = vperm.xlu0 %692, %v458_v28  }
 0x213   :  { %508 = vperm.xlu1 %693, %v465_v31  }
 0x216   :  { %514 = vperm.xlu0 %692, %v479_v32  }
 0x217   :  { %511 = vperm.xlu1 %693, %v472_v34  }
 0x21a   :  { %520 = vperm.xlu0 %692, %v493_v35  }
 0x21b   :  { %523 = vperm.xlu1 %693, %v500_v36  }
 0x28d   :  { %v503_v38 = vpop.permute.xlu0 %502 }
 0x28e   :  { %v518_v39 = vpop.permute.xlu1 %517  ;;  %v530_v44 = vrot.slane %v503_v38, %v529_v40 }
 0x28f   :  { %v550_v0 = vrot.slane %v518_v39, %v529_v40 }
 0x291   :  { %v506_v41 = vpop.permute.xlu0 %505 }
 0x292   :  { %v534_v42 = vrot.slane %v506_v41, %v529_v40  ;;  %v509_v43 = vpop.permute.xlu1 %508 }
 0x293   :  { %v538_v45 = vrot.slane %v509_v43, %v529_v40 }
 0x294   :  { %v560_v46 = vsel %vm559_vm3, %v534_v42, %v530_v44 }
 0x295   :  { %v515_v47 = vpop.permute.xlu0 %514  ;;  %v562_v49 = vsel %vm561_vm4, %v538_v45, %v560_v46 }
 0x296   :  { %v512_v48 = vpop.permute.xlu1 %511  ;;  %v546_v50 = vrot.slane %v515_v47, %v529_v40 }
 0x297   :  { %v542_v8 = vrot.slane %v512_v48, %v529_v40 }
 0x299   :  { %v564_v51 = vsel %vm563_vm5, %v542_v8, %v562_v49  ;;  %v521_v52 = vpop.permute.xlu0 %520 }
 0x29a   :  { %v566_v5 = vsel %vm565_vm6, %v546_v50, %v564_v51  ;;  %v554_v53 = vrot.slane %v521_v52, %v529_v40  ;;  %v524_v54 = vpop.permute.xlu1 %523 }
 0x29b   :  { %v558_v55 = vrot.slane %v524_v54, %v529_v40  ;;  %v568_v56 = vsel %vm567_vm7, %v550_v0, %v566_v5 }
 0x29c   :  { %v570_v57 = vsel %vm569_vm8, %v554_v53, %v568_v56 }
 0x29d   :  { %v572_v58 = vsel %vm571_vm9, %v558_v55, %v570_v57 }
 0x29e   :  { %574 = vxpose.xlu0.b32.start.end [1/1] (short) (narrow) %v572_v58, 8 }
 0x31e   :  { %v590_v59 = vpop.trf.xlu0 }
 0x31f   :  { %v607_v60 = vsel %vm606_vm10, %v590_v59, -inf }
 0x320   :  { %608 = vmax.xlane.f32.xlu1 %v607_v60 }
 0x3ad   :  { %v609_v61 = vpop.xlane.xlu1 %608 }
 0x3ae   :  { %v610_v62 = vsub.f32 %v590_v59, %v609_v61 }
 0x3b0   :  { %v611_v63 = vmul.f32 1.442695, %v610_v62 }
 0x3b2   :  { %712 = vpow2.f32 %v611_v63 }
 0x3bc   :  { %v713_v1 = vpop.eup %712 }
 0x3bd   :  { %v613_v2 = vsel %vm606_vm10, %v713_v1, 0.0 }
 0x3be   :  { %614 = vadd.xlane.f32.xlu0 %v613_v2 }
 0x44b   :  { %v615_v3 = vpop.xlane.xlu0 %614 }
 0x44c   :  { %714 = vrcp.f32 %v615_v3 }
 0x456   :  { %v715_v4 = vpop.eup %714 }
 0x457   :  { %v617_v6 = vmul.f32 %v715_v4, %v713_v1 }
 0x459   :  { %618 = vst.msk [vmem:[#allocation8] sm:$0x3] %vm606_vm10, %v617_v6 }
 0x45a   :  { %793 = shalt.err (!%p790_p0)
}
 0x45b   :  { %s794_s12 = scalar_lea.hbm %s949_s5, 32 }
 0x45c   :  { %p795_p1 = scmp.ne.s32.totalorder %s949_s5, %s794_s12  ;;  %p798_p2 = scmp.lt.u32.totalorder %s794_s12, %s949_s5 }
 0x45e   :  { %p800_p3 = pnand %p798_p2, %p795_p1 }
 0x460   :  { %803 = shalt.err (!%p800_p3)
}
 0x461   :  { %628 = dma.vmem_to_hbm [thread:$0]  %s626_s8, 32, %s949_s5, [#allocation4]  }
 0x462   :  { %808 = dma.done.wait [#allocation4], 32  }
 0x463   :  { %809 = vsyncadd [#allocation4], 4294967264 }
 0x464   :  { %632 = vsyncpa [#allocation3], 1 }
 0x465   :  { %633 = vsyncpa [#allocation6], 1 }
 0x466   :  { %634 = vsyncpa [#allocation4], 1 }

</bundles_post_ra>
